<compile_context>
chip_gen: v7x
topology: tpu7x:2x2x1
jax: 0.10.0
libtpu: 0.0.40
codegen_flags: <defaults>
</compile_context>

<pallas_src>
import jax
import jax.numpy as jnp
from jax.experimental import pallas as pl
from jax.experimental.pallas import tpu as pltpu

_LANE = 128
# Only split the copy across two grid points (two TensorCores on v7x) when the
# tensor is large enough that the extra grid-step overhead is negligible.
_MIN_SPLIT_BYTES = 1 * 1024 * 1024


def _dma_copy_2d(x2d: jax.Array, nchunks: int, chunk_rows: int) -> jax.Array:
    """HBM -> HBM copy of a 2D slab, as `nchunks` row-chunked DMAs."""
    rows, width = x2d.shape
    nbytes = x2d.size * jnp.dtype(x2d.dtype).itemsize

    def kernel(x_hbm, o_hbm, sem):
        # Each grid point copies its own disjoint row-chunk straight from the
        # input HBM buffer to the output HBM buffer (no VMEM round-trip).
        i = pl.program_id(0)
        start = i * chunk_rows
        cp = pltpu.make_async_copy(
            x_hbm.at[pl.ds(start, chunk_rows), :],
            o_hbm.at[pl.ds(start, chunk_rows), :],
            sem,
        )
        cp.start()
        cp.wait()

    return pl.pallas_call(
        kernel,
        out_shape=jax.ShapeDtypeStruct((rows, width), x2d.dtype),
        grid_spec=pltpu.PrefetchScalarGridSpec(
            num_scalar_prefetch=0,
            grid=(nchunks,),
            in_specs=[pl.BlockSpec(memory_space=pl.ANY)],
            out_specs=pl.BlockSpec(memory_space=pl.ANY),
            scratch_shapes=[pltpu.SemaphoreType.DMA],
        ),
        compiler_params=pltpu.CompilerParams(
            dimension_semantics=("parallel",),
        ),
        cost_estimate=pl.CostEstimate(
            flops=0, transcendentals=0, bytes_accessed=2 * nbytes),
    )(x2d)


def identity(x: jax.Array, *, copy: bool = True) -> jax.Array:
    """Identity forward pass.

    copy=False: faithful PyTorch semantics — returns `x` itself, zero bytes
                moved. Use when the caller is allowed to consume/alias x.
    copy=True : returns a fresh buffer equal to x via a single (or 2-chunk)
                HBM->HBM DMA in a Pallas kernel.
    """
    if not copy:
        return x

    orig_shape = x.shape
    n = x.size
    if n == 0:
        return x
    itemsize = jnp.dtype(x.dtype).itemsize

    if n % _LANE == 0:
        # Lane-dense 2D view (free for contiguous data); widest width that divides n.
        width = _LANE
        for w in (1024, 512, 256):
            if n % w == 0:
                width = w
                break
        rows = n // width
    else:
        # Irregular sizes: one contiguous (1, n) DMA. Never touches VMEM, so
        # there is no residency hazard regardless of size.
        rows, width = 1, n

    # Split into 2 chunks (engages both TCs' DMA paths on v7x) only when the
    # copy is big and the chunk boundary lands on a packed-sublane-tile row.
    sublane_pack = max(8, 32 // itemsize)   # 8 for f32, 16 for bf16, 32 for i8/fp8
    nchunks = 2 if (rows % (2 * sublane_pack) == 0
                    and n * itemsize >= _MIN_SPLIT_BYTES) else 1
    chunk_rows = rows // nchunks

    out2d = _dma_copy_2d(x.reshape(rows, width), nchunks, chunk_rows)
    return out2d.reshape(orig_shape)


if __name__ == "__main__":
    key = jax.random.PRNGKey(0)
    k0, k1, k2, k3 = jax.random.split(key, 4)

    # Primary test: small NCHW input consistent with typical conv-style usage.
    x = jax.random.normal(k0, (2, 4, 16, 16), dtype=jnp.float32)
    y = identity(x)
    jax.block_until_ready(y)
    assert y.shape == x.shape, (y.shape, x.shape)
    assert y.dtype == x.dtype, (y.dtype, x.dtype)
    assert bool(jnp.all(y == x)), "identity output mismatch (NCHW case)"

    # Large enough (2 MiB) to take the 2-chunk parallel-grid DMA path.
    x_big = jax.random.normal(k1, (2048, 256), dtype=jnp.float32)
    y_big = identity(x_big)
    jax.block_until_ready(y_big)
    assert bool(jnp.all(y_big == x_big)), "identity output mismatch (chunked DMA case)"

    # Irregular size (not a multiple of 128): same DMA path, single copy.
    x_odd = jax.random.normal(k2, (3, 5, 7), dtype=jnp.float32)
    y_odd = identity(x_odd)
    jax.block_until_ready(y_odd)
    assert bool(jnp.all(y_odd == x_odd)), "identity output mismatch (odd-size case)"

    # Sub-32-bit dtype.
    x_bf16 = jax.random.normal(k3, (8, 384), dtype=jnp.bfloat16)
    y_bf16 = identity(x_bf16)
    jax.block_until_ready(y_bf16)
    assert bool(jnp.all(y_bf16 == x_bf16)), "identity output mismatch (bf16 case)"

    # Zero-copy path (faithful PyTorch Identity semantics: returns x as-is).
    y_alias = identity(x, copy=False)
    assert y_alias is x, "copy=False path must return x unchanged"

    print("KERNEL_OK")
</pallas_src>

<mosaic_0001>
module attributes {stable_mosaic.version = 11 : i64} {
  func.func @kernel(%arg0: i32, %arg1: memref<2x1024xf32, #tpu.memory_space<any>>, %arg2: memref<2x1024xf32, #tpu.memory_space<any>>, %arg3: memref<!tpu.dma_semaphore, #tpu.memory_space<semaphore_mem>>) attributes {dimension_semantics = [#tpu.dimension_semantics<parallel>], iteration_bounds = array<i64: 1>, scalar_prefetch = 0 : i64, scratch_operands = 1 : i64, tpu.core_type = #tpu.core_type<tc>, window_params = [{}, {}]} {
    %c2_i32 = arith.constant 2 : i32
    %0 = arith.muli %arg0, %c2_i32 : i32
    %c0_i32 = arith.constant 0 : i32
    %1 = tpu.memref_slice %arg1[%0, %c0_i32] : memref<2x1024xf32, #tpu.memory_space<any>> -> memref<2x1024xf32, #tpu.memory_space<any>>
    %c0_i32_0 = arith.constant 0 : i32
    %2 = tpu.memref_slice %arg2[%0, %c0_i32_0] : memref<2x1024xf32, #tpu.memory_space<any>> -> memref<2x1024xf32, #tpu.memory_space<any>>
    tpu.enqueue_dma source(%1 : memref<2x1024xf32, #tpu.memory_space<any>>) target(%2 : memref<2x1024xf32, #tpu.memory_space<any>>) target_semaphore(%arg3 : memref<!tpu.dma_semaphore, #tpu.memory_space<semaphore_mem>>)
    %c0_i32_1 = arith.constant 0 : i32
    %3 = tpu.memref_slice %arg1[%0, %c0_i32_1] : memref<2x1024xf32, #tpu.memory_space<any>> -> memref<2x1024xf32, #tpu.memory_space<any>>
    %c0_i32_2 = arith.constant 0 : i32
    %4 = tpu.memref_slice %arg2[%0, %c0_i32_2] : memref<2x1024xf32, #tpu.memory_space<any>> -> memref<2x1024xf32, #tpu.memory_space<any>>
    tpu.wait_dma2 semaphore(%arg3 : memref<!tpu.dma_semaphore, #tpu.memory_space<semaphore_mem>>) src(%3 : memref<2x1024xf32, #tpu.memory_space<any>>) dst(%4 : memref<2x1024xf32, #tpu.memory_space<any>>)
    return
  }
}

</mosaic_0001>

<bundles_post_ra>
// kernel: tpu_custom_call.1
= control target key start
LH: loop header
LB: loop body
LE: loop exit
PB: predicated region body
PF: predicated region fallthrough
CT: control target
= control target key end

     0   :  { %s47_s6 = smov [#allocation2]   ;;  %s48_s7 = smov [#allocation3]   ;;  %s66_s0 = inlined_call_operand.hbm [shape: f32[2,1024], index: 0, kind: input, shape index: {}]   ;;  %s67_s1 = inlined_call_operand.hbm [shape: f32[2,1024], index: 1, kind: output, shape index: {}]  }
   0x1   :  { %s49_s8 = smov 0  }
   0x2   :  { %26 = dma.general %s66_s0, 256, %s67_s1, %s47_s6, %s48_s7, [#allocation4], %s49_s8, 0  }
   0x3   :  { %45 = dma.done.wait [#allocation2], 256 }
   0x4   :  { %46 = vsyncadd [#allocation2], 4294967040 }
   0x5   :  { %31 = vsyncmov [#allocation2] }
   0x8   :  { %s32_s13 = vpop.sfrf %31 }
   0x9   :  { %p41_p0 = scmp.ne.s32.totalorder %s32_s13, 0 }
   0xb   :  { %36 = shalt.err (%p41_p0)  }

</bundles_post_ra>
